<compile_context>
chip_gen: v7x
topology: tpu7x:2x2x1
jax: 0.10.0
libtpu: 0.0.40
codegen_flags: <defaults>
</compile_context>

<pallas_src>
import functools

import jax
import jax.numpy as jnp
from jax import lax
from jax.experimental import pallas as pl
from jax.experimental.pallas import tpu as pltpu


def _fused_bn_add_relu_conv_kernel(x87_ref, x86_ref, gb_ref, w_ref, o_ref,
                                   *, eps, n_reduce):
    # ---- batch statistics over (N, H*W) per channel (biased variance, as
    #      PyTorch BN uses for normalization in training mode).  Two-pass
    #      variance avoids E[x^2]-E[x]^2 cancellation; the centered tensor is
    #      consumed inside the reduction only (mean is folded into the shift).
    x = x87_ref[...]                                    # (N, C, HW) f32
    inv_n = 1.0 / n_reduce
    s = jnp.sum(x, axis=2, keepdims=True)               # lane reduce  -> (N, C, 1)
    s = jnp.sum(s, axis=0, keepdims=True)               # batch reduce -> (1, C, 1)
    mean = s * inv_n
    v = jnp.sum(jnp.square(x - mean), axis=2, keepdims=True)
    v = jnp.sum(v, axis=0, keepdims=True)
    var = v * inv_n                                     # biased variance
    inv_std = lax.rsqrt(var + eps)                      # EUP slot, effectively free

    # ---- normalize + affine + residual add + ReLU (VPU, data stays in VMEM).
    #      mean folded into shift -> no full-size centered temporary.
    gamma = gb_ref[:, 0:1][None]                        # (1, C, 1)
    beta = gb_ref[:, 1:2][None]                         # (1, C, 1)
    scale = gamma * inv_std
    shift = beta - mean * scale
    y = jnp.maximum(x86_ref[...] + x * scale + shift, 0.0)     # (N, C, HW) f32

    # ---- 1x1 conv == matmul over channels: (Cout_blk, C) @ (C, HW) on the MXU,
    #      bf16 operands, f32 accumulation.
    yb = y.astype(jnp.bfloat16)
    w = w_ref[...]                                      # (Cout_blk, C) bf16
    for b in range(yb.shape[0]):                        # static, tiny batch loop
        o_ref[b] = jnp.dot(w, yb[b],
                           preferred_element_type=jnp.float32).astype(o_ref.dtype)


def _round_up(v, m):
    return (v + m - 1) // m * m


def _num_tensorcores():
    # v5e / v6e expose one TensorCore per chip; v7x exposes two (megacore).
    try:
        kind = (getattr(jax.devices()[0], "device_kind", "") or "").lower()
        if "v7" in kind or "7x" in kind:
            return 2
    except Exception:
        pass
    return 1


def _single_buffered_spec(shape, index_map):
    # These blocks use a constant index_map (never re-DMA'd across the grid),
    # so the default second pipeline buffer is pure VMEM waste.
    if hasattr(pl, "Buffered"):
        try:
            return pl.BlockSpec(shape, index_map, pipeline_mode=pl.Buffered(1))
        except TypeError:
            pass
    return pl.BlockSpec(shape, index_map)


def module_forward(x87, x86, gamma, beta, conv_w, *, eps=1e-5):
    """x87, x86: NCHW float32.  conv_w: (Cout, Cin, 1, 1).  Returns NCHW f32."""
    N, C, H, W = x87.shape
    Cout = conv_w.shape[0]
    HW = H * W

    # Free, contiguous reshapes only -- no HBM transposes.
    x87_r = x87.reshape(N, C, HW)
    x86_r = x86.reshape(N, C, HW)
    w2d = conv_w.reshape(Cout, C).astype(jnp.bfloat16)        # bf16 MXU operand
    gb = jnp.stack([gamma.astype(jnp.float32),
                    beta.astype(jnp.float32)], axis=1)        # (C, 2)

    # Split Cout across TensorCores only where a second core exists (v7x); on
    # single-core v5e/v6e a grid of 2 would just rerun the whole BN pass.
    cout_splits = 1
    if _num_tensorcores() >= 2 and Cout % 2 == 0 and (Cout // 2) % 8 == 0:
        cout_splits = 2
    cout_blk = Cout // cout_splits

    # VMEM budget for the fully-resident design, including in-kernel
    # temporaries (f32 y / normalize intermediates + the bf16 copy of y) and
    # the pipeline buffering actually requested below.
    HWp = _round_up(HW, 128)
    act_tile = N * _round_up(C, 8) * HWp * 4                        # one f32 activation
    vmem_est = (
        2 * act_tile                                                # x87 + x86 (single-buffered)
        + _round_up(C, 8) * 128 * 4                                 # gamma|beta (C,2) lane-padded
        + 2 * _round_up(cout_blk, 16) * _round_up(C, 128) * 2       # bf16 weight slice (double-buf)
        + 2 * N * _round_up(cout_blk, 8) * HWp * 4                  # output slice (double-buf)
        + 2 * act_tile + act_tile // 2                              # in-kernel temporaries
    )
    assert vmem_est < 48 * 1024 * 1024, (
        "Activations too large for the fully-fused resident kernel "
        f"(~{vmem_est / 2**20:.1f} MiB needed); a row-tiled two-phase "
        "(stats then normalize+matmul) variant would be required for this shape.")
    # TODO(synk): for much larger N*H*W, add a row-tiled two-phase fallback
    # instead of the single resident block used here.
    vmem_limit = min(max(int(vmem_est * 3 // 2) + (4 << 20), 32 << 20), 56 << 20)

    kernel = functools.partial(_fused_bn_add_relu_conv_kernel,
                               eps=float(eps), n_reduce=float(N * HW))

    out3d = pl.pallas_call(
        kernel,
        out_shape=jax.ShapeDtypeStruct((N, Cout, HW), jnp.float32),
        grid_spec=pltpu.PrefetchScalarGridSpec(
            num_scalar_prefetch=0,
            grid=(cout_splits,),
            in_specs=[
                _single_buffered_spec((N, C, HW), lambda j: (0, 0, 0)),  # x87 (resident)
                _single_buffered_spec((N, C, HW), lambda j: (0, 0, 0)),  # x86 (resident)
                _single_buffered_spec((C, 2), lambda j: (0, 0)),         # gamma | beta
                pl.BlockSpec((cout_blk, C), lambda j: (j, 0)),           # conv weight slice
            ],
            out_specs=pl.BlockSpec((N, cout_blk, HW), lambda j: (0, j, 0)),
        ),
        compiler_params=pltpu.CompilerParams(
            dimension_semantics=(("parallel",) if cout_splits > 1
                                 else ("arbitrary",)),
            vmem_limit_bytes=vmem_limit),
    )(x87_r, x86_r, gb, w2d)

    # TODO(synk): BN running_mean/running_var (momentum=0.1) buffer updates are
    # training-time side effects that do not affect the returned tensor.
    # TODO(synk): HW=196 pads to 256 lanes (masked output stores, ~23% idle MXU
    # columns); a channels-last / pad+slice output layout would fix that but
    # reintroduces an HBM transpose or extra XLA copy that costs more than it
    # saves at this (1,1024,14,14)->(1,256,14,14) size.
    return out3d.reshape(N, Cout, H, W)


def _reference(x87, x86, gamma, beta, conv_w, eps=1e-5):
    mean = jnp.mean(x87, axis=(0, 2, 3), keepdims=True)
    var = jnp.var(x87, axis=(0, 2, 3), keepdims=True)   # biased
    xhat = (x87 - mean) * lax.rsqrt(var + eps)
    x88 = xhat * gamma[None, :, None, None] + beta[None, :, None, None]
    x90 = jnp.maximum(x86 + x88, 0.0)
    return lax.conv_general_dilated(
        x90, conv_w, window_strides=(1, 1), padding="VALID",
        dimension_numbers=("NCHW", "OIHW", "NCHW"))


if __name__ == "__main__":
    # Small shapes consistent with the module (original: N=1, Cin=1024, 14x14, Cout=256).
    N, Cin, H, W, Cout = 2, 32, 8, 8, 16

    key = jax.random.PRNGKey(0)
    k1, k2, k3, k4, k5 = jax.random.split(key, 5)
    x87 = jax.random.normal(k1, (N, Cin, H, W), dtype=jnp.float32)
    x86 = jax.random.normal(k2, (N, Cin, H, W), dtype=jnp.float32)

    gamma = 1.0 + 0.1 * jax.random.normal(k4, (Cin,), dtype=jnp.float32)
    beta = 0.1 * jax.random.normal(k5, (Cin,), dtype=jnp.float32)
    conv_w = (jax.random.normal(k3, (Cout, Cin, 1, 1), dtype=jnp.float32)
              * (1.0 / jnp.sqrt(Cin)))

    fwd = jax.jit(functools.partial(module_forward, eps=1e-5))
    out = jax.block_until_ready(fwd(x87, x86, gamma, beta, conv_w))

    ref = _reference(x87, x86, gamma, beta, conv_w)
    assert out.shape == (N, Cout, H, W), out.shape
    # bf16 MXU operands (f32 accumulation) -> relaxed tolerance vs. f32 reference.
    assert jnp.allclose(out, ref, atol=2e-2, rtol=2e-2), float(
        jnp.max(jnp.abs(out - ref)))

    print("KERNEL_OK")
</pallas_src>

<mosaic_0001>
module attributes {stable_mosaic.version = 11 : i64} {
  func.func @_fused_bn_add_relu_conv_kernel(%arg0: i32, %arg1: memref<2x32x64xf32, #tpu.memory_space<vmem>>, %arg2: memref<2x32x64xf32, #tpu.memory_space<vmem>>, %arg3: memref<32x2xf32, #tpu.memory_space<vmem>>, %arg4: memref<16x32xbf16, #tpu.memory_space<vmem>>, %arg5: memref<2x16x64xf32, #tpu.memory_space<vmem>>) attributes {dimension_semantics = [#tpu.dimension_semantics<arbitrary>], iteration_bounds = array<i64: 1>, scalar_prefetch = 0 : i64, scratch_operands = 0 : i64, tpu.core_type = #tpu.core_type<tc>, window_params = [{pipeline_mode = #tpu.pipeline_mode<synchronous>, transform_indices = @transform_0, window_bounds = array<i64: 2, 32, 64>}, {pipeline_mode = #tpu.pipeline_mode<synchronous>, transform_indices = @transform_1, window_bounds = array<i64: 2, 32, 64>}, {pipeline_mode = #tpu.pipeline_mode<synchronous>, transform_indices = @transform_2, window_bounds = array<i64: 32, 2>}, {transform_indices = @transform_3, window_bounds = array<i64: 16, 32>}, {transform_indices = @transform_4, window_bounds = array<i64: 2, 16, 64>}]} {
    %c0 = arith.constant 0 : index
    %c0_0 = arith.constant 0 : index
    %c0_1 = arith.constant 0 : index
    %0 = vector.load %arg1[%c0, %c0_0, %c0_1] : memref<2x32x64xf32, #tpu.memory_space<vmem>>, vector<2x32x64xf32>
    %cst = arith.constant dense<0.000000e+00> : vector<2x32xf32>
    %1 = vector.multi_reduction <add>, %0, %cst [2] : vector<2x32x64xf32> to vector<2x32xf32>
    %2 = vector.shape_cast %1 : vector<2x32xf32> to vector<2x32x1xf32>
    %cst_2 = arith.constant dense<0.000000e+00> : vector<32x1xf32>
    %3 = vector.multi_reduction <add>, %2, %cst_2 [0] : vector<2x32x1xf32> to vector<32x1xf32>
    %4 = vector.shape_cast %3 : vector<32x1xf32> to vector<1x32x1xf32>
    %cst_3 = arith.constant 7.812500e-03 : f32
    %5 = vector.broadcast %cst_3 : f32 to vector<1x32x1xf32>
    %6 = arith.mulf %4, %5 : vector<1x32x1xf32>
    %7 = vector.broadcast %6 : vector<1x32x1xf32> to vector<2x32x64xf32>
    %8 = arith.subf %0, %7 : vector<2x32x64xf32>
    %9 = arith.mulf %8, %8 : vector<2x32x64xf32>
    %cst_4 = arith.constant dense<0.000000e+00> : vector<2x32xf32>
    %10 = vector.multi_reduction <add>, %9, %cst_4 [2] : vector<2x32x64xf32> to vector<2x32xf32>
    %11 = vector.shape_cast %10 : vector<2x32xf32> to vector<2x32x1xf32>
    %cst_5 = arith.constant dense<0.000000e+00> : vector<32x1xf32>
    %12 = vector.multi_reduction <add>, %11, %cst_5 [0] : vector<2x32x1xf32> to vector<32x1xf32>
    %13 = vector.shape_cast %12 : vector<32x1xf32> to vector<1x32x1xf32>
    %cst_6 = arith.constant 7.812500e-03 : f32
    %14 = vector.broadcast %cst_6 : f32 to vector<1x32x1xf32>
    %15 = arith.mulf %13, %14 : vector<1x32x1xf32>
    %cst_7 = arith.constant 9.99999974E-6 : f32
    %16 = vector.broadcast %cst_7 : f32 to vector<1x32x1xf32>
    %17 = arith.addf %15, %16 : vector<1x32x1xf32>
    %18 = math.rsqrt %17 : vector<1x32x1xf32>
    %c0_8 = arith.constant 0 : index
    %c0_9 = arith.constant 0 : index
    %19 = vector.load %arg3[%c0_8, %c0_9] : memref<32x2xf32, #tpu.memory_space<vmem>>, vector<32x1xf32>
    %20 = vector.shape_cast %19 : vector<32x1xf32> to vector<1x32x1xf32>
    %c0_10 = arith.constant 0 : index
    %c1 = arith.constant 1 : index
    %21 = vector.load %arg3[%c0_10, %c1] : memref<32x2xf32, #tpu.memory_space<vmem>>, vector<32x1xf32>
    %22 = vector.shape_cast %21 : vector<32x1xf32> to vector<1x32x1xf32>
    %23 = arith.mulf %20, %18 : vector<1x32x1xf32>
    %24 = arith.mulf %6, %23 : vector<1x32x1xf32>
    %25 = arith.subf %22, %24 : vector<1x32x1xf32>
    %c0_11 = arith.constant 0 : index
    %c0_12 = arith.constant 0 : index
    %c0_13 = arith.constant 0 : index
    %26 = vector.load %arg2[%c0_11, %c0_12, %c0_13] : memref<2x32x64xf32, #tpu.memory_space<vmem>>, vector<2x32x64xf32>
    %27 = vector.broadcast %23 : vector<1x32x1xf32> to vector<2x32x64xf32>
    %28 = arith.mulf %0, %27 : vector<2x32x64xf32>
    %29 = arith.addf %26, %28 : vector<2x32x64xf32>
    %30 = vector.broadcast %25 : vector<1x32x1xf32> to vector<2x32x64xf32>
    %31 = arith.addf %29, %30 : vector<2x32x64xf32>
    %cst_14 = arith.constant 0.000000e+00 : f32
    %32 = vector.broadcast %cst_14 : f32 to vector<2x32x64xf32>
    %33 = arith.maximumf %31, %32 : vector<2x32x64xf32>
    %34 = arith.truncf %33 : vector<2x32x64xf32> to vector<2x32x64xbf16>
    %c0_15 = arith.constant 0 : index
    %c0_16 = arith.constant 0 : index
    %35 = vector.load %arg4[%c0_15, %c0_16] : memref<16x32xbf16, #tpu.memory_space<vmem>>, vector<16x32xbf16>
    %36 = vector.extract_strided_slice %34 {offsets = [0, 0, 0], sizes = [1, 32, 64], strides = [1, 1, 1]} : vector<2x32x64xbf16> to vector<1x32x64xbf16>
    %37 = vector.shape_cast %36 : vector<1x32x64xbf16> to vector<32x64xbf16>
    %cst_17 = arith.constant dense<0.000000e+00> : vector<16x64xf32>
    %38 = tpu.matmul %35, %37, %cst_17 {dimension_numbers = #tpu.dot_dimension_numbers<[1], [0], [0], [1], [0, 0, 1, 1], [], []>} : vector<16x32xbf16>, vector<32x64xbf16>, vector<16x64xf32> -> vector<16x64xf32>
    %c0_18 = arith.constant 0 : index
    %c0_19 = arith.constant 0 : index
    %c0_20 = arith.constant 0 : index
    %39 = vector.load %arg5[%c0_18, %c0_19, %c0_20] : memref<2x16x64xf32, #tpu.memory_space<vmem>>, vector<1x16x64xf32>
    %40 = vector.shape_cast %39 : vector<1x16x64xf32> to vector<16x64xf32>
    %41 = vector.shape_cast %38 : vector<16x64xf32> to vector<1x16x64xf32>
    tpu.vector_store %arg5[%c0_18, %c0_19, %c0_20], %41 {strides = array<i32>} : memref<2x16x64xf32, #tpu.memory_space<vmem>>, vector<1x16x64xf32>,
    %42 = vector.extract_strided_slice %34 {offsets = [1, 0, 0], sizes = [1, 32, 64], strides = [1, 1, 1]} : vector<2x32x64xbf16> to vector<1x32x64xbf16>
    %43 = vector.shape_cast %42 : vector<1x32x64xbf16> to vector<32x64xbf16>
    %cst_21 = arith.constant dense<0.000000e+00> : vector<16x64xf32>
    %44 = tpu.matmul %35, %43, %cst_21 {dimension_numbers = #tpu.dot_dimension_numbers<[1], [0], [0], [1], [0, 0, 1, 1], [], []>} : vector<16x32xbf16>, vector<32x64xbf16>, vector<16x64xf32> -> vector<16x64xf32>
    %c1_22 = arith.constant 1 : index
    %c0_23 = arith.constant 0 : index
    %c0_24 = arith.constant 0 : index
    %45 = vector.load %arg5[%c1_22, %c0_23, %c0_24] : memref<2x16x64xf32, #tpu.memory_space<vmem>>, vector<1x16x64xf32>
    %46 = vector.shape_cast %45 : vector<1x16x64xf32> to vector<16x64xf32>
    %47 = vector.shape_cast %44 : vector<16x64xf32> to vector<1x16x64xf32>
    tpu.vector_store %arg5[%c1_22, %c0_23, %c0_24], %47 {strides = array<i32>} : memref<2x16x64xf32, #tpu.memory_space<vmem>>, vector<1x16x64xf32>,
    return
  }
  func.func @transform_0(%arg0: i32) -> (i32, i32, i32) {
    %c0_i32 = arith.constant 0 : i32
    %c0_i32_0 = arith.constant 0 : i32
    %c0_i32_1 = arith.constant 0 : i32
    %c0_i32_2 = arith.constant 0 : i32
    return %c0_i32, %c0_i32_0, %c0_i32_1 : i32, i32, i32
  }
  func.func @transform_1(%arg0: i32) -> (i32, i32, i32) {
    %c0_i32 = arith.constant 0 : i32
    %c0_i32_0 = arith.constant 0 : i32
    %c0_i32_1 = arith.constant 0 : i32
    %c0_i32_2 = arith.constant 0 : i32
    return %c0_i32, %c0_i32_0, %c0_i32_1 : i32, i32, i32
  }
  func.func @transform_2(%arg0: i32) -> (i32, i32) {
    %c0_i32 = arith.constant 0 : i32
    %c0_i32_0 = arith.constant 0 : i32
    %c0_i32_1 = arith.constant 0 : i32
    return %c0_i32, %c0_i32_0 : i32, i32
  }
  func.func @transform_3(%arg0: i32) -> (i32, i32) {
    %c0_i32 = arith.constant 0 : i32
    %c0_i32_0 = arith.constant 0 : i32
    return %arg0, %c0_i32 : i32, i32
  }
  func.func @transform_4(%arg0: i32) -> (i32, i32, i32) {
    %c0_i32 = arith.constant 0 : i32
    %c0_i32_0 = arith.constant 0 : i32
    %c0_i32_1 = arith.constant 0 : i32
    return %c0_i32, %arg0, %c0_i32_0 : i32, i32, i32
  }
}

</mosaic_0001>

<bundles_post_ra>
// kernel: module_forward.1
= control target key start
LH: loop header
LB: loop body
LE: loop exit
PB: predicated region body
PF: predicated region fallthrough
CT: control target
= control target key end

     0   :  { %vm26_vm0 = vcmask 523264   ;;  %v378_v56 = vmov 0   ;;  %s379_s8 = smov 1   ;;  %vm382_vm1 = vmmov 0   ;;  %vm238_vm2 = vcmask 261120   ;;  %s563_s0 = inlined_call_operand.vmem [shape: f32[2,32,64], index: 0, kind: input, shape index: {}]   ;;  %s564_s2 = inlined_call_operand.vmem [shape: f32[32,2], index: 2, kind: input, shape index: {}]   ;;  %s565_s3 = inlined_call_operand.vmem [shape: bf16[16,32], index: 3, kind: input, shape index: {}]   ;;  %s566_s1 = inlined_call_operand.vmem [shape: f32[2,32,64], index: 1, kind: input, shape index: {}]   ;;  %s567_s4 = inlined_call_operand.vmem [shape: f32[2,16,64], index: 4, kind: output, shape index: {}]  }
   0x1   :  { %v411_v0 = vld [vmem:[%s563_s0 + $0x20] sm:$0xff]  ;;  %v421_v2 = vld [vmem:[%s563_s0 + $0x28] sm:$0xff]  ;;  %v439_v8 = vld [vmem:[%s563_s0 + $0x18] sm:$0xff]  ;;  %365 = vset.pattern.permute.xlu0 %v378_v56  ;;  %366 = vset.pattern.permute.xlu1 %v378_v56 }
   0x2   :  { %v416_v1 = vld [vmem:[%s563_s0] sm:$0xff]  ;;  %v39_v3 = vsel %vm26_vm0, %v411_v0, 0.0  ;;  %v430_v5 = vld [vmem:[%s563_s0 + $0x8] sm:$0xff]  ;;  %v42_v6 = vsel %vm26_vm0, %v421_v2, 0.0  ;;  %v444_v9 = vld [vmem:[%s563_s0 + $0x10] sm:$0xff]  ;;  %v36_v10 = vsel %vm26_vm0, %v439_v8, 0.0 }
   0x3   :  { %v27_v4 = vsel %vm26_vm0, %v416_v1, 0.0  ;;  %40 = vadd.xlane.f32.xlu1 %v39_v3  ;;  %v30_v7 = vsel %vm26_vm0, %v430_v5, 0.0  ;;  %v33_v11 = vsel %vm26_vm0, %v444_v9, 0.0  ;;  %v453_v12 = vld [vmem:[%s563_s0 + $0x38] sm:$0xff]  ;;  %v458_v13 = vld [vmem:[%s563_s0 + $0x30] sm:$0xff] }
   0x4   :  { %28 = vadd.xlane.f32.xlu0 %v27_v4  ;;  %v48_v14 = vsel %vm26_vm0, %v453_v12, 0.0  ;;  %v45_v15 = vsel %vm26_vm0, %v458_v13, 0.0 }
   0x7   :  { %43 = vadd.xlane.f32.xlu1 %v42_v6 }
   0x8   :  { %31 = vadd.xlane.f32.xlu0 %v30_v7 }
   0xb   :  { %37 = vadd.xlane.f32.xlu1 %v36_v10 }
   0xc   :  { %34 = vadd.xlane.f32.xlu0 %v33_v11 }
   0xf   :  { %49 = vadd.xlane.f32.xlu1 %v48_v14 }
  0x10   :  { %46 = vadd.xlane.f32.xlu0 %v45_v15 }
  0x90   :  { %v41_v16 = vpop.xlane.xlu1 %40 }
  0x91   :  { %v29_v17 = vpop.xlane.xlu0 %28 }
  0x92   :  { %v51_v18 = vadd.f32 %v41_v16, %v29_v17 }
  0x94   :  { %v464_v19 = vmul.f32 0.0078125, %v51_v18  ;;  %v44_v20 = vpop.xlane.xlu1 %43 }
  0x95   :  { %v32_v21 = vpop.xlane.xlu0 %31 }
  0x96   :  { %v52_v22 = vadd.f32 %v44_v20, %v32_v21  ;;  %v59_v23 = vsub.f32 %v416_v1, %v464_v19  ;;  %v63_v24 = vsub.f32 %v411_v0, %v464_v19  ;;  %v115_v20 = vld [vmem:[%s564_s2] sm:$0xff] }
  0x98   :  { %v470_v25 = vmul.f32 0.0078125, %v52_v22  ;;  %v67_v26 = vmul.f32 %v59_v23, %v59_v23  ;;  %v38_v27 = vpop.xlane.xlu1 %37  ;;  %v71_v30 = vmul.f32 %v63_v24, %v63_v24 }
  0x99   :  { %v35_v28 = vpop.xlane.xlu0 %34 }
  0x9a   :  { %v75_v29 = vsel %vm26_vm0, %v67_v26, 0.0  ;;  %v60_v31 = vsub.f32 %v430_v5, %v470_v25  ;;  %v64_v32 = vsub.f32 %v421_v2, %v470_v25  ;;  %v87_v39 = vsel %vm26_vm0, %v71_v30, 0.0  ;;  %v116_v26 = vld [vmem:[%s564_s2 + $0x8] sm:$0xff] }
  0x9b   :  { %76 = vadd.xlane.f32.xlu0 %v75_v29 }
  0x9c   :  { %v68_v33 = vmul.f32 %v60_v31, %v60_v31  ;;  %v50_v34 = vpop.xlane.xlu1 %49  ;;  %v72_v36 = vmul.f32 %v64_v32, %v64_v32  ;;  %v118_v31 = vld [vmem:[%s564_s2 + $0x18] sm:$0xff]  ;;  %v117_v32 = vld [vmem:[%s564_s2 + $0x10] sm:$0xff] }
  0x9d   :  { %v47_v35 = vpop.xlane.xlu0 %46  ;;  %v54_v37 = vadd.f32 %v50_v34, %v38_v27 }
  0x9e   :  { %v53_v38 = vadd.f32 %v47_v35, %v35_v28  ;;  %v78_v40 = vsel %vm26_vm0, %v68_v33, 0.0  ;;  %v90_v43 = vsel %vm26_vm0, %v72_v36, 0.0 }
  0x9f   :  { %88 = vadd.xlane.f32.xlu0 %v87_v39  ;;  %79 = vadd.xlane.f32.xlu1 %v78_v40  ;;  %v479_v41 = vmul.f32 0.0078125, %v54_v37  ;;  %v380_v37 = vmov 1  }
  0xa0   :  { %v481_v42 = vmul.f32 0.0078125, %v53_v38 }
  0xa1   :  { %v62_v44 = vsub.f32 %v439_v8, %v479_v41  ;;  %v66_v46 = vsub.f32 %v453_v12, %v479_v41 }
  0xa2   :  { %v61_v45 = vsub.f32 %v444_v9, %v481_v42  ;;  %v65_v47 = vsub.f32 %v458_v13, %v481_v42 }
  0xa3   :  { %91 = vadd.xlane.f32.xlu1 %v90_v43  ;;  %v70_v48 = vmul.f32 %v62_v44, %v62_v44  ;;  %v74_v52 = vmul.f32 %v66_v46, %v66_v46  ;;  %v381_v44 = vmov 0.0  }
  0xa4   :  { %v69_v49 = vmul.f32 %v61_v45, %v61_v45  ;;  %v73_v53 = vmul.f32 %v65_v47, %v65_v47  ;;  %344 = vmatprep.subr.bf16.mxu0 %v381_v44  ;;  %352 = vmatprep.subr.bf16.mxu1 %v381_v44 }
  0xa5   :  { %v84_v50 = vsel %vm26_vm0, %v70_v48, 0.0  ;;  %v96_v54 = vsel %vm26_vm0, %v74_v52, 0.0  ;;  %348 = vmatprep.mubr.msk.bf16.mxu0 %vm382_vm1, %v381_v44  ;;  %356 = vmatprep.mubr.msk.bf16.mxu1 %vm382_vm1, %v381_v44  ;;  %v147_v52 = vld [vmem:[%s566_s1] sm:$0xff] }
  0xa6   :  { %v81_v51 = vsel %vm26_vm0, %v69_v49, 0.0  ;;  %v93_v55 = vsel %vm26_vm0, %v73_v53, 0.0  ;;  %v151_v53 = vld [vmem:[%s566_s1 + $0x20] sm:$0xff] }
  0xa7   :  { %85 = vadd.xlane.f32.xlu1 %v84_v50  ;;  %82 = vadd.xlane.f32.xlu0 %v81_v51 }
  0xab   :  { %97 = vadd.xlane.f32.xlu1 %v96_v54  ;;  %94 = vadd.xlane.f32.xlu0 %v93_v55 }
 0x128   :  { %v77_v57 = vpop.xlane.xlu0 %76 }
 0x12c   :  { %v80_v58 = vpop.xlane.xlu1 %79  ;;  %v89_v59 = vpop.xlane.xlu0 %88 }
 0x12d   :  { %v99_v60 = vadd.f32 %v89_v59, %v77_v57 }
 0x12f   :  { %v103_v61 = vmul.f32 0.0078125, %v99_v60 }
 0x130   :  { %v92_v62 = vpop.xlane.xlu1 %91 }
 0x131   :  { %v107_v63 = vadd.f32 1e-05, %v103_v61  ;;  %v100_v3 = vadd.f32 %v92_v62, %v80_v58 }
 0x133   :  { %370 = vrsqrt.f32 %v107_v63  ;;  %v104_v4 = vmul.f32 0.0078125, %v100_v3 }
 0x134   :  { %v86_v6 = vpop.xlane.xlu1 %85  ;;  %v83_v7 = vpop.xlane.xlu0 %82 }
 0x135   :  { %v108_v10 = vadd.f32 1e-05, %v104_v4 }
 0x137   :  { %372 = vrsqrt.f32 %v108_v10 }
 0x138   :  { %v98_v11 = vpop.xlane.xlu1 %97  ;;  %v95_v14 = vpop.xlane.xlu0 %94 }
 0x139   :  { %v102_v15 = vadd.f32 %v98_v11, %v86_v6  ;;  %v101_v16 = vadd.f32 %v95_v14, %v83_v7 }
 0x13b   :  { %v106_v17 = vmul.f32 0.0078125, %v102_v15  ;;  %v105_v18 = vmul.f32 0.0078125, %v101_v16 }
 0x13d   :  { %v371_v21 = vpop.eup %370  ;;  %v110_v22 = vadd.f32 1e-05, %v106_v17  ;;  %v109_v23 = vadd.f32 1e-05, %v105_v18  ;;  %v149_v17 = vld [vmem:[%s566_s1 + $0x10] sm:$0xff] }
 0x13e   :  { %v119_v24 = vmul.f32 %v371_v21, %v115_v20  ;;  %v153_v18 = vld [vmem:[%s566_s1 + $0x30] sm:$0xff] }
 0x13f   :  { %374 = vrsqrt.f32 %v110_v22 }
 0x140   :  { %376 = vrsqrt.f32 %v109_v23  ;;  %v123_v27 = vmul.f32 %v119_v24, %v464_v19 }
 0x141   :  { %v373_v28 = vpop.eup %372 }
 0x142   :  { %131 = vrot.lane.b32.xlu0 %v123_v27, %s379_s8  ;;  %v120_v29 = vmul.f32 %v373_v28, %v116_v26 }
 0x144   :  { %v124_v30 = vmul.f32 %v120_v29, %v470_v25 }
 0x146   :  { %133 = vrot.lane.b32.xlu1 %v124_v30, %s379_s8  ;;  %157 = vperm.xlu0 %365, %v119_v24  }
 0x149   :  { %v375_v33 = vpop.eup %374 }
 0x14a   :  { %v377_v34 = vpop.eup %376  ;;  %v122_v35 = vmul.f32 %v375_v33, %v118_v31 }
 0x14b   :  { %v121_v19 = vmul.f32 %v377_v34, %v117_v32 }
 0x14c   :  { %172 = vperm.xlu0 %365, %v122_v35   ;;  %v126_v25 = vmul.f32 %v122_v35, %v479_v41 }
 0x14d   :  { %v125_v36 = vmul.f32 %v121_v19, %v481_v42 }
 0x14f   :  { %135 = vrot.lane.b32.xlu1 %v125_v36, %s379_s8  ;;  %v369_v36 = vld [vmem:[%s565_s3] sm:$0xff]  }
 0x150   :  { %368 = vset.pattern.permute.xlu0 %v380_v37 }
 0x153   :  { %137 = vrot.lane.b32.xlu1 %v126_v25, %s379_s8 }
 0x157   :  { %162 = vperm.xlu1 %366, %v120_v29  }
 0x15b   :  { %167 = vperm.xlu1 %366, %v121_v19  }
 0x15f   :  { %367 = vset.pattern.permute.xlu1 %v380_v37 }
 0x1b4   :  { %v132_v38 = vpop.permute.xlu0 %131 }
 0x1b5   :  { %v143_v39 = vsub.f32 %v115_v20, %v132_v38 }
 0x1b7   :  { %193 = vperm.xlu1 %367, %v143_v39  }
 0x1b8   :  { %v134_v40 = vpop.permute.xlu1 %133 }
 0x1b9   :  { %v144_v43 = vsub.f32 %v116_v26, %v134_v40 }
 0x1bb   :  { %198 = vperm.xlu0 %368, %v144_v43  }
 0x1c1   :  { %v136_v45 = vpop.permute.xlu1 %135 }
 0x1c2   :  { %v145_v42 = vsub.f32 %v117_v32, %v136_v45 }
 0x1c4   :  { %203 = vperm.xlu1 %367, %v145_v42  }
 0x1c5   :  { %v138_v46 = vpop.permute.xlu1 %137  ;;  %v158_v48 = vpop.permute.xlu0 %157 }
 0x1c6   :  { %v146_v47 = vsub.f32 %v118_v31, %v138_v46  ;;  %v175_v50 = vmul.f32 %v158_v48, %v416_v1  ;;  %v179_v51 = vmul.f32 %v158_v48, %v411_v0  ;;  %v148_v1 = vld [vmem:[%s566_s1 + $0x8] sm:$0xff] }
 0x1c7   :  { %v152_v0 = vld [vmem:[%s566_s1 + $0x28] sm:$0xff] }
 0x1c8   :  { %208 = vperm.xlu1 %367, %v146_v47   ;;  %v183_v58 = vadd.f32 %v175_v50, %v147_v52  ;;  %v187_v59 = vadd.f32 %v179_v51, %v151_v53 }
 0x1cb   :  { %v173_v56 = vpop.permute.xlu0 %172 }
 0x1cc   :  { %v178_v20 = vmul.f32 %v173_v56, %v439_v8  ;;  %v182_v21 = vmul.f32 %v173_v56, %v453_v12 }
 0x1d6   :  { %v163_v41 = vpop.permute.xlu1 %162 }
 0x1d7   :  { %v176_v54 = vmul.f32 %v163_v41, %v430_v5  ;;  %v180_v55 = vmul.f32 %v163_v41, %v421_v2 }
 0x1d9   :  { %v184_v62 = vadd.f32 %v176_v54, %v148_v1  ;;  %v188_v63 = vadd.f32 %v180_v55, %v152_v0 }
 0x1da   :  { %v168_v49 = vpop.permute.xlu1 %167 }
 0x1db   :  { %v177_v15 = vmul.f32 %v168_v49, %v444_v9  ;;  %v181_v16 = vmul.f32 %v168_v49, %v458_v13  ;;  %v150_v9 = vld [vmem:[%s566_s1 + $0x18] sm:$0xff] }
 0x1dc   :  { %v154_v13 = vld [vmem:[%s566_s1 + $0x38] sm:$0xff]  ;;  %v186_v28 = vadd.f32 %v178_v20, %v150_v9 }
 0x1dd   :  { %v185_v23 = vadd.f32 %v177_v15, %v149_v17  ;;  %v189_v24 = vadd.f32 %v181_v16, %v153_v18  ;;  %v190_v29 = vadd.f32 %v182_v21, %v154_v13 }
 0x236   :  { %v194_v57 = vpop.permute.xlu1 %193 }
 0x237   :  { %v211_v60 = vadd.f32 %v194_v57, %v183_v58  ;;  %v215_v61 = vadd.f32 %v194_v57, %v187_v59 }
 0x239   :  { %v219_v2 = vmax.f32 %v211_v60, 0.0  ;;  %v223_v6 = vmax.f32 %v215_v61, 0.0 }
 0x23a   :  { %v199_v3 = vpop.permute.xlu0 %198 }
 0x23b   :  { %v212_v5 = vadd.f32 %v199_v3, %v184_v62  ;;  %v216_v4 = vadd.f32 %v199_v3, %v188_v63 }
 0x23d   :  { %v220_v7 = vmax.f32 %v212_v5, 0.0  ;;  %v224_v10 = vmax.f32 %v216_v4, 0.0 }
 0x23f   :  { %v227_v11 = vpack.c.bf16 %v220_v7, %v219_v2  ;;  %v229_v14 = vpack.c.bf16 %v224_v10, %v223_v6 }
 0x241   :  { %345 = vmatpush3.bf16.msra.mxu0 %v227_v11  ;;  %353 = vmatpush3.bf16.msra.mxu1 %v229_v14 }
 0x242   :  { %346 = vmatprep.subr.bf16.mxu0 %v381_v44  ;;  %354 = vmatprep.subr.bf16.mxu1 %v381_v44 }
 0x243   :  { %v204_v22 = vpop.permute.xlu1 %203 }
 0x244   :  { %v213_v26 = vadd.f32 %v204_v22, %v185_v23  ;;  %v217_v27 = vadd.f32 %v204_v22, %v189_v24 }
 0x246   :  { %v221_v31 = vmax.f32 %v213_v26, 0.0  ;;  %v225_v32 = vmax.f32 %v217_v27, 0.0 }
 0x247   :  { %v209_v8 = vpop.permute.xlu1 %208 }
 0x248   :  { %v214_v30 = vadd.f32 %v209_v8, %v186_v28  ;;  %v218_v12 = vadd.f32 %v209_v8, %v190_v29 }
 0x24a   :  { %v222_v33 = vmax.f32 %v214_v30, 0.0  ;;  %v226_v34 = vmax.f32 %v218_v12, 0.0 }
 0x24c   :  { %v228_v35 = vpack.c.bf16 %v222_v33, %v221_v31  ;;  %v230_v19 = vpack.c.bf16 %v226_v34, %v225_v32 }
 0x24e   :  { %347 = vmatpush3.bf16.msra.mxu0 %v228_v35  ;;  %355 = vmatpush3.bf16.msra.mxu1 %v230_v19 }
 0x251   :  { %349 = vmatmul.mubr.msk.bf16.vlgmr.msra.gmra.mrb[0].mxu0 %vm238_vm2, %v369_v36  ;;  %357 = vmatmul.mubr.msk.bf16.vlgmr.msra.gmra.mrb[0].mxu1 %vm238_vm2, %v369_v36 }
 0x324   :  { %v276_v37 = vpop.f32.mrb[0].mxu0  ;;  %v319_v25 = vpop.f32.mrb[0].mxu1 }
 0x325   :  { %283 = vst.msk [vmem:[%s567_s4] sm:$0xff] %vm26_vm0, %v276_v37  ;;  %336 = vst.msk [vmem:[%s567_s4 + $0x10] sm:$0xff] %vm26_vm0, %v319_v25  ;;  %v350_v38 = vpop.f32.mrb[1].mxu0  ;;  %v358_v39 = vpop.f32.mrb[1].mxu1 }
 0x326   :  { %v279_v40 = vpop.f32.mrb[2].mxu0  ;;  %v322_v43 = vpop.f32.mrb[2].mxu1 }
 0x327   :  { %284 = vst.msk [vmem:[%s567_s4 + $0x8] sm:$0xff] %vm26_vm0, %v279_v40  ;;  %337 = vst.msk [vmem:[%s567_s4 + $0x18] sm:$0xff] %vm26_vm0, %v322_v43  ;;  %v351_v44 = vpop.f32.mrb[3].mxu0  ;;  %v359_v45 = vpop.f32.mrb[3].mxu1 }

</bundles_post_ra>
